<compile_context>
chip_gen: v6e
topology: v6e:2x2x1
jax: 0.10.0
libtpu: 0.0.40
codegen_flags: <defaults>
</compile_context>

<pallas_src>
import functools

import jax
import jax.numpy as jnp
from jax.experimental import pallas as pl
from jax.experimental.pallas import tpu as pltpu


_MAX_LANE_TILE = 32768                   # cap for the lane (spatial) tile when tiling
_TARGET_STEP_BYTES = 4 * 1024 * 1024     # aim >= ~4 MB of x/out HBM traffic per step


# --------------------------------------------------------------------------
# Trace-time hardware sizing helpers (all failures fall back to safe defaults)
# --------------------------------------------------------------------------
def _device_kind():
    try:
        return jax.devices()[0].device_kind.lower()
    except Exception:
        return ""


def _vmem_capacity_bytes():
    try:
        cap = getattr(pltpu.get_tpu_info(), "vmem_capacity_bytes", None)
        if cap:
            return int(cap)
    except Exception:
        pass
    if "v7" in _device_kind():
        return 64 * 1024 * 1024          # per-TensorCore VMEM on v7x
    return 128 * 1024 * 1024             # v5e / v6e


def _vmem_limit_bytes():
    # ~75% of physical per-core VMEM (<=48 MiB on v7x, ~96 MiB on v5e/v6e).
    return min(int(_vmem_capacity_bytes() * 3 // 4), 100 * 1024 * 1024)


def _num_tensorcores():
    return 2 if "v7" in _device_kind() else 1


def _has_bf16_vpu():
    return "v5" not in _device_kind()    # v5e VPU has no native bf16


def _choose_tiles(N, HW, per_lane_hbm, per_lane_vmem, budget,
                  lane_tile=None, batch_tile=None):
    """Pick (Nb, TL): images per grid step and lane (spatial) tile."""
    # --- lane (spatial) tile ---
    if lane_tile is not None:                               # test/debug override
        TL = max((int(lane_tile) // 128) * 128, 128)
        if int(lane_tile) >= HW or TL >= HW:
            TL = HW
    elif HW * per_lane_vmem <= budget:
        TL = HW                                             # whole spatial extent
    else:
        TL = min(budget // max(per_lane_vmem, 1), _MAX_LANE_TILE)
        TL = max((TL // 128) * 128, 128)
    if TL < HW:
        return 1, TL                                        # lane-tiled: one image/step

    # --- batch blocking (only when one step covers the full spatial extent) ---
    if batch_tile is not None:                              # test/debug override
        return max(1, min(int(batch_tile), N)), TL
    per_image_hbm = HW * per_lane_hbm
    per_image_vmem = HW * per_lane_vmem
    Nb = max(1, _TARGET_STEP_BYTES // max(per_image_hbm, 1))
    Nb = min(Nb, N, max(1, budget // max(per_image_vmem, 1)))
    return int(Nb), TL


# --------------------------------------------------------------------------
# Kernel 1 (two-pass path): per-channel sum / sum-of-squares partial reduction
# --------------------------------------------------------------------------
def _stats_kernel(x_ref, sum_ref, sumsq_ref, *,
                  N, HW, Nb, TL, nL, total, steps, n_split):
    p = pl.program_id(0)          # partial-accumulator id ("parallel" axis)
    s = pl.program_id(1)          # sequential step within this partial

    @pl.when(s == 0)
    def _():
        sum_ref[...] = jnp.zeros_like(sum_ref)
        sumsq_ref[...] = jnp.zeros_like(sumsq_ref)

    g = p * steps + s                       # global step
    gc = jnp.minimum(g, total - 1)          # clamped (matches the index_map)
    bb = gc // nL                           # batch-block index
    l = gc % nL                             # lane-block index

    ragged_split = (n_split * steps) != total
    ragged_lanes = (HW % TL) != 0
    ragged_batch = (N % Nb) != 0

    def accum(xj):                                            # xj: (Cin, TL) f32
        sum_ref[0] = sum_ref[0] + jnp.sum(xj, axis=1, keepdims=True)
        sumsq_ref[0] = sumsq_ref[0] + jnp.sum(xj * xj, axis=1, keepdims=True)

    if Nb == 1:
        # Lane-tiled path: full tiles take the unmasked fast path; only the
        # ragged last lane block / clamped tail steps pay iota+compare+select.
        def fast():
            accum(x_ref[0].astype(jnp.float32))

        if not (ragged_lanes or ragged_split):
            fast()
        else:
            if ragged_lanes and ragged_split:
                full = jnp.logical_and(l != nL - 1, g < total)
            elif ragged_lanes:
                full = l != nL - 1
            else:
                full = g < total

            @pl.when(full)
            def _():
                fast()

            @pl.when(jnp.logical_not(full))
            def _():
                x = x_ref[0].astype(jnp.float32)
                if ragged_lanes:
                    lane = jax.lax.broadcasted_iota(jnp.int32, x.shape, 1)
                    valid = (lane + l * TL) < HW
                    if ragged_split:
                        valid = jnp.logical_and(valid, g < total)
                    x = jnp.where(valid, x, 0.0)
                else:
                    x = jnp.where(g < total, x, 0.0)
                accum(x)
    else:
        # Batch-blocked path (TL == HW): only batch / split tails can be short.
        if ragged_batch or ragged_split:
            n_valid = jnp.minimum(N - bb * Nb, Nb)
            if ragged_split:
                n_valid = jnp.where(g < total, n_valid, 0)

            def body(j, c):
                @pl.when(j < n_valid)
                def _():
                    accum(x_ref[j].astype(jnp.float32))
                return c

            jax.lax.fori_loop(0, Nb, body, 0)
        else:
            def body(j, c):
                accum(x_ref[j].astype(jnp.float32))
                return c

            jax.lax.fori_loop(0, Nb, body, 0)


def _channel_stats(x3d, *, n_split, vmem_limit, lane_tile=None, batch_tile=None):
    N, Cin, HW = x3d.shape
    itemsize = x3d.dtype.itemsize
    budget = int(vmem_limit * 0.7)
    # Per-lane per-image VMEM: 2x pipelined native x block + f32 copy + square temp.
    Nb, TL = _choose_tiles(N, HW, Cin * itemsize,
                           2 * Cin * itemsize + 2 * Cin * 4, budget,
                           lane_tile=lane_tile, batch_tile=batch_tile)
    nB, nL = pl.cdiv(N, Nb), pl.cdiv(HW, TL)
    total = nB * nL
    n_split = max(1, min(n_split, total))
    steps = pl.cdiv(total, n_split)

    def x_map(p, s):
        g = jnp.minimum(p * steps + s, total - 1)   # clamp; kernel masks tail steps
        return (g // nL, 0, g % nL)

    kernel = functools.partial(
        _stats_kernel, N=N, HW=HW, Nb=Nb, TL=TL, nL=nL,
        total=total, steps=steps, n_split=n_split)
    return pl.pallas_call(
        kernel,
        out_shape=(jax.ShapeDtypeStruct((n_split, Cin, 1), jnp.float32),
                   jax.ShapeDtypeStruct((n_split, Cin, 1), jnp.float32)),
        grid_spec=pltpu.PrefetchScalarGridSpec(
            num_scalar_prefetch=0,
            grid=(n_split, steps),
            in_specs=[pl.BlockSpec((Nb, Cin, TL), x_map)],
            out_specs=(pl.BlockSpec((1, Cin, 1), lambda p, s: (p, 0, 0)),
                       pl.BlockSpec((1, Cin, 1), lambda p, s: (p, 0, 0)))),
        compiler_params=pltpu.CompilerParams(
            dimension_semantics=("parallel", "arbitrary"),
            vmem_limit_bytes=vmem_limit),
        cost_estimate=pl.CostEstimate(
            flops=3 * N * Cin * HW,
            transcendentals=0,
            bytes_accessed=N * Cin * HW * itemsize + 2 * n_split * Cin * 4),
    )(x3d)


# --------------------------------------------------------------------------
# Kernel 2 (two-pass path): in-kernel stats combine + BN + ReLU + 1x1 conv (MXU)
# --------------------------------------------------------------------------
def _conv_kernel(x_ref, psum_ref, psumsq_ref, gamma_ref, beta_ref, w_ref, b_ref,
                 o_ref, *, Nb, inv_count, eps, cast_bf16, compute_f32):
    # Fold the BN statistics combine into the kernel: partial sums -> mean/var
    # -> scale/shift.  Tiny Cin-sized VPU work + one EUP rsqrt per step, and it
    # removes the host-side op chain between the two pallas_calls.
    s = jnp.sum(psum_ref[...], axis=0)                      # (Cin, 1)
    ss = jnp.sum(psumsq_ref[...], axis=0)                   # (Cin, 1)
    mean = s * inv_count
    var = jnp.maximum(ss * inv_count - mean * mean, 0.0)    # biased (training fwd)
    inv_std = jax.lax.rsqrt(var + eps)
    scale = gamma_ref[...] * inv_std                        # (Cin, 1)
    shift = beta_ref[...] - mean * scale                    # (Cin, 1)

    w = w_ref[...]                                          # (Cout, Cin)
    if cast_bf16:
        w = w.astype(jnp.bfloat16)
    b = b_ref[...]                                          # (Cout, 1)

    def one_image(j):
        xj = x_ref[j]                                       # (Cin, TL), spatial on lanes
        if compute_f32:
            h = jnp.maximum(xj.astype(jnp.float32) * scale + shift, 0.0)
        else:                                               # bf16 VPU path (v6e/v7x)
            h = jnp.maximum(xj * scale.astype(xj.dtype) + shift.astype(xj.dtype), 0.0)
        if cast_bf16:
            h = h.astype(jnp.bfloat16)
        o = jnp.dot(w, h, preferred_element_type=jnp.float32) + b
        o_ref[j] = o.astype(o_ref.dtype)

    if Nb == 1:
        one_image(0)
    else:
        # OOB images of a ragged last batch block compute on garbage and are
        # dropped by Pallas on writeback (per-lane / per-image confined).
        def body(j, c):
            one_image(j)
            return c
        jax.lax.fori_loop(0, Nb, body, 0)


def _fused_bn_relu_conv(x3d, psum, psumsq, gamma2, beta2, w2d, b2d, *,
                        eps, inv_count, out_dtype, cast_bf16, compute_f32,
                        vmem_limit, lane_tile=None, batch_tile=None):
    N, Cin, HW = x3d.shape
    Cout = w2d.shape[0]
    n_split = psum.shape[0]
    in_item = x3d.dtype.itemsize
    out_item = jnp.dtype(out_dtype).itemsize

    param_bytes = (Cout * Cin + 2 * Cin + Cout + 2 * n_split * Cin) * 4
    budget = max(int(vmem_limit * 0.7) - param_bytes, 4 * 1024 * 1024)
    per_lane_vmem = 2 * Cin * in_item + 2 * Cout * out_item + (Cin + Cout) * 4
    if cast_bf16:
        per_lane_vmem += Cin * 2
    Nb, TL = _choose_tiles(N, HW, Cin * in_item + Cout * out_item,
                           per_lane_vmem, budget,
                           lane_tile=lane_tile, batch_tile=batch_tile)
    nB, nL = pl.cdiv(N, Nb), pl.cdiv(HW, TL)
    total = nB * nL

    def xo_map(g):
        return (g // nL, 0, g % nL)

    kernel = functools.partial(
        _conv_kernel, Nb=Nb, inv_count=inv_count, eps=eps,
        cast_bf16=cast_bf16, compute_f32=compute_f32)
    return pl.pallas_call(
        kernel,
        out_shape=jax.ShapeDtypeStruct((N, Cout, HW), out_dtype),
        grid_spec=pltpu.PrefetchScalarGridSpec(
            num_scalar_prefetch=0,
            grid=(total,),                                  # flat parallel axis
            in_specs=[pl.BlockSpec((Nb, Cin, TL), xo_map),
                      pl.BlockSpec((n_split, Cin, 1), lambda g: (0, 0, 0)),
                      pl.BlockSpec((n_split, Cin, 1), lambda g: (0, 0, 0)),
                      pl.BlockSpec((Cin, 1), lambda g: (0, 0)),
                      pl.BlockSpec((Cin, 1), lambda g: (0, 0)),
                      pl.BlockSpec((Cout, Cin), lambda g: (0, 0)),
                      pl.BlockSpec((Cout, 1), lambda g: (0, 0))],
            out_specs=pl.BlockSpec((Nb, Cout, TL), xo_map)),
        compiler_params=pltpu.CompilerParams(
            dimension_semantics=("parallel",),
            vmem_limit_bytes=vmem_limit),
        cost_estimate=pl.CostEstimate(
            flops=2 * N * HW * Cin * Cout + 4 * N * HW * Cin,
            transcendentals=total * Cin,
            bytes_accessed=N * Cin * HW * in_item + N * Cout * HW * out_item
                           + param_bytes),
    )(x3d, psum, psumsq, gamma2, beta2, w2d, b2d)


# --------------------------------------------------------------------------
# Single-pass kernel: whole x resident in VMEM, read from HBM exactly once.
# --------------------------------------------------------------------------
def _single_pass_kernel(x_ref, gamma_ref, beta_ref, w_ref, b_ref, o_ref, *,
                        N, inv_count, eps, cast_bf16, compute_f32):
    xf = x_ref[...].astype(jnp.float32)                              # (N, Cin, HW)
    s = jnp.sum(jnp.sum(xf, axis=2, keepdims=True), axis=0)          # (Cin, 1)
    ss = jnp.sum(jnp.sum(xf * xf, axis=2, keepdims=True), axis=0)    # (Cin, 1)
    mean = s * inv_count
    var = jnp.maximum(ss * inv_count - mean * mean, 0.0)
    inv_std = jax.lax.rsqrt(var + eps)
    scale = gamma_ref[...] * inv_std
    shift = beta_ref[...] - mean * scale

    w = w_ref[...]
    if cast_bf16:
        w = w.astype(jnp.bfloat16)
    b = b_ref[...]

    def body(n, c):
        xn = x_ref[n]                                                # (Cin, HW)
        if compute_f32:
            h = jnp.maximum(xn.astype(jnp.float32) * scale + shift, 0.0)
        else:
            h = jnp.maximum(xn * scale.astype(xn.dtype) + shift.astype(xn.dtype), 0.0)
        if cast_bf16:
            h = h.astype(jnp.bfloat16)
        o = jnp.dot(w, h, preferred_element_type=jnp.float32) + b
        o_ref[n] = o.astype(o_ref.dtype)
        return c

    jax.lax.fori_loop(0, N, body, 0)


def _single_pass_fits(N, Cin, Cout, HW, in_item, out_item, vmem_limit):
    need = N * Cin * HW * (in_item + 8)      # x + f32 copy + squared temp
    need += N * Cout * HW * (out_item + 4)   # out + f32 working copy (conservative)
    need += (Cout * Cin + 2 * Cin + Cout) * 4
    return need <= int(vmem_limit * 0.6)


# --------------------------------------------------------------------------
# Public wrapper
# --------------------------------------------------------------------------
def bn_relu_conv(x_nchw, gamma, beta, conv_w, conv_b, *,
                 kernel_size=1, stride=1, padding=0, eps=1e-5,
                 matmul_bf16=None, force_two_pass=False,
                 lane_tile=None, batch_tile=None, n_split=None):
    assert kernel_size == 1 and stride == 1 and padding == 0, (
        "Pallas path implements the module's default 1x1 / stride-1 / no-pad conv")
    N, Cin, H, W = x_nchw.shape
    Cout = conv_w.shape[0]
    HW = H * W

    vmem_limit = _vmem_limit_bytes()
    in_item = x_nchw.dtype.itemsize
    out_dtype = x_nchw.dtype
    out_item = jnp.dtype(out_dtype).itemsize

    x_is_bf16 = x_nchw.dtype == jnp.bfloat16
    if matmul_bf16 is None:
        matmul_bf16 = bool(x_is_bf16)        # opt-in only for f32 inputs (numerics)
    cast_bf16 = bool(matmul_bf16)
    compute_f32 = not (x_is_bf16 and _has_bf16_vpu())

    # Free contiguous reshape (no transpose): spatial sits on the 128-lane axis.
    x3d = x_nchw.reshape(N, Cin, HW)
    gamma2 = gamma.reshape(Cin, 1).astype(jnp.float32)
    beta2 = beta.reshape(Cin, 1).astype(jnp.float32)
    w2d = conv_w.reshape(Cout, Cin)
    b2d = conv_b.reshape(Cout, 1).astype(jnp.float32)
    inv_count = 1.0 / float(N * HW)

    if (not force_two_pass
            and _single_pass_fits(N, Cin, Cout, HW, in_item, out_item, vmem_limit)):
        kernel = functools.partial(
            _single_pass_kernel, N=N, inv_count=inv_count, eps=eps,
            cast_bf16=cast_bf16, compute_f32=compute_f32)
        out3d = pl.pallas_call(
            kernel,
            out_shape=jax.ShapeDtypeStruct((N, Cout, HW), out_dtype),
            compiler_params=pltpu.CompilerParams(vmem_limit_bytes=vmem_limit),
        )(x3d, gamma2, beta2, w2d, b2d)
        return out3d.reshape(N, Cout, H, W)

    # ---- two-pass path: partial BN stats, then fused BN+ReLU+1x1 conv ----
    if n_split is None:
        n_split = 2 if _num_tensorcores() >= 2 else 1
    psum, psumsq = _channel_stats(x3d, n_split=n_split, vmem_limit=vmem_limit,
                                  lane_tile=lane_tile, batch_tile=batch_tile)
    out3d = _fused_bn_relu_conv(
        x3d, psum, psumsq, gamma2, beta2, w2d, b2d,
        eps=eps, inv_count=inv_count, out_dtype=out_dtype,
        cast_bf16=cast_bf16, compute_f32=compute_f32, vmem_limit=vmem_limit,
        lane_tile=lane_tile, batch_tile=batch_tile)
    return out3d.reshape(N, Cout, H, W)


# --------------------------------------------------------------------------
# Pure-JAX reference (training-mode BN -> ReLU -> 1x1 conv) and self-test
# --------------------------------------------------------------------------
def _reference(x, gamma, beta, conv_w, conv_b, eps=1e-5):
    mean = jnp.mean(x, axis=(0, 2, 3))
    var = jnp.var(x, axis=(0, 2, 3))
    xn = (x - mean[None, :, None, None]) * jax.lax.rsqrt(var + eps)[None, :, None, None]
    xn = xn * gamma[None, :, None, None] + beta[None, :, None, None]
    h = jnp.maximum(xn, 0.0)
    Cout, Cin = conv_w.shape[:2]
    return (jnp.einsum("nchw,oc->nohw", h, conv_w.reshape(Cout, Cin))
            + conv_b[None, :, None, None])


if __name__ == "__main__":
    key = jax.random.PRNGKey(0)
    k_x, k_g, k_b, k_w, k_cb = jax.random.split(key, 5)

    def make_inputs(N, Cin, H, W, Cout):
        x = jax.random.normal(k_x, (N, Cin, H, W), dtype=jnp.float32)
        gamma = 1.0 + 0.1 * jax.random.normal(k_g, (Cin,), dtype=jnp.float32)
        beta = 0.1 * jax.random.normal(k_b, (Cin,), dtype=jnp.float32)
        conv_w = jax.random.normal(k_w, (Cout, Cin, 1, 1), jnp.float32) / jnp.sqrt(Cin)
        conv_b = 0.1 * jax.random.normal(k_cb, (Cout,), dtype=jnp.float32)
        return x, gamma, beta, conv_w, conv_b

    def check(args, **kw):
        y = jax.jit(functools.partial(bn_relu_conv, **kw))(*args)
        y = jax.block_until_ready(y)
        ref = _reference(*args)
        assert y.shape == ref.shape, (y.shape, ref.shape)
        err = jnp.max(jnp.abs(y - ref))
        assert jnp.allclose(y, ref, atol=1e-4, rtol=1e-4), f"max abs err {err}"

    # 1) Single-pass resident-VMEM path (primary small-shape case).
    check(make_inputs(2, 4, 16, 16, 8))
    # 2) Two-pass path: lane-tiled stats/conv with a ragged last lane block,
    #    2-way split stats, and a clamped tail step.
    check(make_inputs(3, 4, 17, 17, 8),
          force_two_pass=True, lane_tile=128, n_split=2)
    # 3) Two-pass path with batch-blocked steps (TL == H*W, Nb > 1) and a
    #    ragged last batch block.
    check(make_inputs(5, 4, 8, 8, 8),
          force_two_pass=True, batch_tile=2, n_split=2)

    print("KERNEL_OK")
</pallas_src>

<mosaic_0001>
module attributes {stable_mosaic.version = 11 : i64} {
  func.func @_single_pass_kernel(%arg0: memref<2x4x256xf32, #tpu.memory_space<vmem>>, %arg1: memref<4x1xf32, #tpu.memory_space<vmem>>, %arg2: memref<4x1xf32, #tpu.memory_space<vmem>>, %arg3: memref<8x4xf32, #tpu.memory_space<vmem>>, %arg4: memref<8x1xf32, #tpu.memory_space<vmem>>, %arg5: memref<2x8x256xf32, #tpu.memory_space<vmem>>) attributes {dimension_semantics = [], scalar_prefetch = 0 : i64, scratch_operands = 0 : i64, tpu.core_type = #tpu.core_type<tc>} {
    %c0 = arith.constant 0 : index
    %c0_0 = arith.constant 0 : index
    %c0_1 = arith.constant 0 : index
    %0 = vector.load %arg0[%c0, %c0_0, %c0_1] : memref<2x4x256xf32, #tpu.memory_space<vmem>>, vector<2x4x256xf32>
    %cst = arith.constant dense<0.000000e+00> : vector<2x4xf32>
    %1 = vector.multi_reduction <add>, %0, %cst [2] : vector<2x4x256xf32> to vector<2x4xf32>
    %2 = vector.shape_cast %1 : vector<2x4xf32> to vector<2x4x1xf32>
    %cst_2 = arith.constant dense<0.000000e+00> : vector<4x1xf32>
    %3 = vector.multi_reduction <add>, %2, %cst_2 [0] : vector<2x4x1xf32> to vector<4x1xf32>
    %4 = arith.mulf %0, %0 : vector<2x4x256xf32>
    %cst_3 = arith.constant dense<0.000000e+00> : vector<2x4xf32>
    %5 = vector.multi_reduction <add>, %4, %cst_3 [2] : vector<2x4x256xf32> to vector<2x4xf32>
    %6 = vector.shape_cast %5 : vector<2x4xf32> to vector<2x4x1xf32>
    %cst_4 = arith.constant dense<0.000000e+00> : vector<4x1xf32>
    %7 = vector.multi_reduction <add>, %6, %cst_4 [0] : vector<2x4x1xf32> to vector<4x1xf32>
    %cst_5 = arith.constant 0.001953125 : f32
    %8 = vector.broadcast %cst_5 : f32 to vector<4x1xf32>
    %9 = arith.mulf %3, %8 : vector<4x1xf32>
    %cst_6 = arith.constant 0.001953125 : f32
    %10 = vector.broadcast %cst_6 : f32 to vector<4x1xf32>
    %11 = arith.mulf %7, %10 : vector<4x1xf32>
    %12 = arith.mulf %9, %9 : vector<4x1xf32>
    %13 = arith.subf %11, %12 : vector<4x1xf32>
    %cst_7 = arith.constant 0.000000e+00 : f32
    %14 = vector.broadcast %cst_7 : f32 to vector<4x1xf32>
    %15 = arith.maximumf %13, %14 : vector<4x1xf32>
    %cst_8 = arith.constant 9.99999974E-6 : f32
    %16 = vector.broadcast %cst_8 : f32 to vector<4x1xf32>
    %17 = arith.addf %15, %16 : vector<4x1xf32>
    %18 = math.rsqrt %17 : vector<4x1xf32>
    %c0_9 = arith.constant 0 : index
    %c0_10 = arith.constant 0 : index
    %19 = vector.load %arg1[%c0_9, %c0_10] : memref<4x1xf32, #tpu.memory_space<vmem>>, vector<4x1xf32>
    %20 = arith.mulf %19, %18 : vector<4x1xf32>
    %c0_11 = arith.constant 0 : index
    %c0_12 = arith.constant 0 : index
    %21 = vector.load %arg2[%c0_11, %c0_12] : memref<4x1xf32, #tpu.memory_space<vmem>>, vector<4x1xf32>
    %22 = arith.mulf %9, %20 : vector<4x1xf32>
    %23 = arith.subf %21, %22 : vector<4x1xf32>
    %c0_13 = arith.constant 0 : index
    %c0_14 = arith.constant 0 : index
    %24 = vector.load %arg3[%c0_13, %c0_14] : memref<8x4xf32, #tpu.memory_space<vmem>>, vector<8x4xf32>
    %c0_15 = arith.constant 0 : index
    %c0_16 = arith.constant 0 : index
    %25 = vector.load %arg4[%c0_15, %c0_16] : memref<8x1xf32, #tpu.memory_space<vmem>>, vector<8x1xf32>
    %c0_i32 = arith.constant 0 : i32
    %c2_i32 = arith.constant 2 : i32
    %26 = arith.addi %c0_i32, %c2_i32 : i32
    %c1_i32 = arith.constant 1 : i32
    scf.for %arg6 = %c0_i32 to %26 step %c1_i32  : i32 {
      %27 = arith.index_cast %arg6 : i32 to index
      %c0_18 = arith.constant 0 : index
      %c0_19 = arith.constant 0 : index
      %28 = vector.load %arg0[%27, %c0_18, %c0_19] : memref<2x4x256xf32, #tpu.memory_space<vmem>>, vector<1x4x256xf32>
      %29 = vector.shape_cast %28 : vector<1x4x256xf32> to vector<4x256xf32>
      %30 = vector.broadcast %20 : vector<4x1xf32> to vector<4x256xf32>
      %31 = arith.mulf %29, %30 : vector<4x256xf32>
      %32 = vector.broadcast %23 : vector<4x1xf32> to vector<4x256xf32>
      %33 = arith.addf %31, %32 : vector<4x256xf32>
      %cst_20 = arith.constant 0.000000e+00 : f32
      %34 = vector.broadcast %cst_20 : f32 to vector<4x256xf32>
      %35 = arith.maximumf %33, %34 : vector<4x256xf32>
      %cst_21 = arith.constant dense<0.000000e+00> : vector<8x256xf32>
      %36 = tpu.matmul %24, %35, %cst_21 {dimension_numbers = #tpu.dot_dimension_numbers<[1], [0], [0], [1], [0, 0, 1, 1], [], []>} : vector<8x4xf32>, vector<4x256xf32>, vector<8x256xf32> -> vector<8x256xf32>
      %37 = vector.broadcast %25 : vector<8x1xf32> to vector<8x256xf32>
      %38 = arith.addf %36, %37 : vector<8x256xf32>
      %39 = arith.index_cast %arg6 : i32 to index
      %c0_22 = arith.constant 0 : index
      %c0_23 = arith.constant 0 : index
      %40 = vector.load %arg5[%39, %c0_22, %c0_23] : memref<2x8x256xf32, #tpu.memory_space<vmem>>, vector<1x8x256xf32>
      %41 = vector.shape_cast %40 : vector<1x8x256xf32> to vector<8x256xf32>
      %42 = vector.shape_cast %38 : vector<8x256xf32> to vector<1x8x256xf32>
      tpu.vector_store %arg5[%39, %c0_22, %c0_23], %42 {strides = array<i32>} : memref<2x8x256xf32, #tpu.memory_space<vmem>>, vector<1x8x256xf32>,
    }
    %c2_i32_17 = arith.constant 2 : i32
    return
  }
}

</mosaic_0001>

<bundles_post_ra>
// kernel: bn_relu_conv.1
= control target key start
LH: loop header
LB: loop body
LE: loop exit
PB: predicated region body
PF: predicated region fallthrough
CT: control target
= control target key end

     0   :  { %vm28_vm0 = vcmask 1043456   ;;  %s317_s28 = smov 0   ;;  %s337_s0 = inlined_call_operand.vmem [shape: f32[2,4,256], index: 0, kind: input, shape index: {}]   ;;  %s338_s3 = inlined_call_operand.vmem [shape: f32[8,4], index: 3, kind: input, shape index: {}]   ;;  %s339_s4 = inlined_call_operand.vmem [shape: f32[8,1], index: 4, kind: input, shape index: {}]   ;;  %s340_s5 = inlined_call_operand.vmem [shape: f32[2,8,256], index: 5, kind: output, shape index: {}]   ;;  %s341_s1 = inlined_call_operand.vmem [shape: f32[4,1], index: 1, kind: input, shape index: {}]   ;;  %s342_s2 = inlined_call_operand.vmem [shape: f32[4,1], index: 2, kind: input, shape index: {}]  }
   0x1   :  { %v20_v0 = vld [vmem:[%s337_s0] sm:$0xff]  ;;  %v21_v1 = vld [vmem:[%s337_s0 + $0x8] sm:$0xff] }
   0x2   :  { %v24_v2 = vcombine.high %v20_v0, %v20_v0  ;;  %v29_v3 = vsel %vm28_vm0, %v20_v0, 0.0  ;;  %v42_v4 = vmul.f32 %v20_v0, %v20_v0  ;;  %v25_v5 = vcombine.high %v21_v1, %v21_v1  ;;  %v300_v20 = vld [vmem:[%s338_s3] sm:$0xff] }
   0x3   :  { %v34_v6 = vsel %vm28_vm0, %v21_v1, 0.0  ;;  %v43_v7 = vmul.f32 %v21_v1, %v21_v1  ;;  %v305_v21 = vld [vmem:[%s339_s4] sm:$0xff] }
   0x4   :  { %v30_v8 = vsel %vm28_vm0, %v24_v2, 0.0  ;;  %v46_v9 = vcombine.high %v42_v4, %v42_v4  ;;  %v50_v10 = vsel %vm28_vm0, %v42_v4, 0.0  ;;  %v35_v11 = vsel %vm28_vm0, %v25_v5, 0.0  ;;  %v70_v38 = vld [vmem:[%s341_s1] sm:$0xf] }
   0x5   :  { %v31_v12 = vadd.f32 %v30_v8, %v29_v3  ;;  %v47_v13 = vcombine.high %v43_v7, %v43_v7  ;;  %v55_v15 = vsel %vm28_vm0, %v43_v7, 0.0  ;;  %v36_v17 = vadd.f32 %v35_v11, %v34_v6  ;;  %v72_v41 = vld [vmem:[%s342_s2] sm:$0xf] }
   0x6   :  { %v51_v14 = vsel %vm28_vm0, %v46_v9, 0.0 }
   0x7   :  { %32 = vadd.xlane.f32.xlu0 %v31_v12  ;;  %v52_v16 = vadd.f32 %v51_v14, %v50_v10  ;;  %v56_v18 = vsel %vm28_vm0, %v47_v13, 0.0 }
   0x8   :  { %v57_v19 = vadd.f32 %v56_v18, %v55_v15 }
   0x9   :  { %53 = vadd.xlane.f32.xlu1 %v52_v16 }
   0xb   :  { %37 = vadd.xlane.f32.xlu0 %v36_v17 }
   0xd   :  { %58 = vadd.xlane.f32.xlu1 %v57_v19 }
  0x90   :  { %v33_v22 = vpop.xlane.xlu0 %32 }
  0x91   :  { %v39_v25 = vsel %vm28_vm0, %v33_v22, 0.0 }
  0x92   :  { %v54_v23 = vpop.xlane.xlu1 %53 }
  0x93   :  { %v60_v29 = vsel %vm28_vm0, %v54_v23, 0.0 }
  0x94   :  { %v38_v24 = vpop.xlane.xlu0 %37 }
  0x95   :  { %v40_v26 = vsel %vm28_vm0, %v38_v24, 0.0 }
  0x96   :  { %v41_v27 = vadd.f32 %v40_v26, %v39_v25  ;;  %v59_v28 = vpop.xlane.xlu1 %58 }
  0x97   :  { %v61_v30 = vsel %vm28_vm0, %v59_v28, 0.0 }
  0x98   :  { %v63_v31 = vmul.f32 0.001953125, %v41_v27  ;;  %v62_v32 = vadd.f32 %v61_v30, %v60_v29 }
  0x9a   :  { %v65_v33 = vmul.f32 %v63_v31, %v63_v31  ;;  %v64_v34 = vmul.f32 0.001953125, %v62_v32 }
  0x9c   :  { %v66_v35 = vsub.f32 %v64_v34, %v65_v33 }
  0x9e   :  { %v67_v36 = vmax.f32 %v66_v35, 0.0 }
  0xa0   :  { %v68_v37 = vadd.f32 1e-05, %v67_v36 }
  0xa2   :  { %238 = vrsqrt.f32 %v68_v37 }
  0xaf   :  { %v239_v39 = vpop.eup %238 }
  0xb0   :  { %v71_v40 = vmul.f32 %v239_v39, %v70_v38 }
  0xb2   :  { %v73_v42 = vmul.f32 %v71_v40, %v63_v31 }
  0xb4   :  { %v74_v43 = vsub.f32 %v72_v41, %v73_v42 }
  0xb5 LB: > { %v250_v44 = vmov 0   ;;  %v251_v45 = vmov 0.0   ;;  %v252_v46 = vmov 839922192   ;;  %v94_v48 = vlaneseq  ;;  %s223_s1 = sshll.u32 %s248_s28, 3  ;;  %s224_s6 = sshll.u32 %s248_s28, 4  ;;  %s248_s28 = sphi %s317_s28, %s82_s28  }
  0xb6   : > { %240 = vset.pattern.permute.xlu0 %v250_v44  ;;  %241 = vset.pattern.permute.xlu1 %v250_v44  ;;  %v92_v47 = vunpack.c.l.s4 %v252_v46  ;;  %s85_s30 = scalar_lea.vmem %s337_s0, %s223_s1  ;;  %vm121_vm1 = vcmask 31744   ;;  %s201_s9 = scalar_lea.vmem %s340_s5, %s224_s6 }
  0xb7   : > { %89 = vperm.xlu0 %240, %v71_v40   ;;  %116 = vperm.xlu1 %241, %v305_v21   ;;  %v95_v50 = vshrl.u32 %v94_v48, 7  ;;  %v86_v54 = vld [vmem:[%s85_s30] sm:$0xff]  ;;  %s82_s28 = sadd.s32 1, %s248_s28  }
  0xb8   : > { %193 = vmatprep.mubr.f32.mxu0 %v251_v45  ;;  %v93_v49 = vunpack.c.0.s8 %v92_v47  ;;  %p79_p0 = scmp.ge.s32.totalorder %s82_s28, 2  }
  0xba   : > { %v96_v51 = vsub.s32 %v93_v49, %v95_v50 }
  0xbb   : > { %102 = vperm.xlu0 %240, %v74_v43  }
 0x132   : > { %v90_v52 = vpop.permute.xlu0 %89  ;;  %v117_v61 = vpop.permute.xlu1 %116 }
 0x133   : > { %v97_v53 = vrot.slane %v90_v52, %v96_v51 }
 0x135   : > { %v99_v56 = vmul.f32 %v97_v53, %v86_v54 }
 0x136   : > { %v103_v55 = vpop.permute.xlu0 %102 }
 0x137   : > { %v110_v57 = vrot.slane %v103_v55, %v96_v51 }
 0x139   : > { %v112_v58 = vadd.f32 %v110_v57, %v99_v56 }
 0x13b   : > { %v113_v59 = vmax.f32 %v112_v58, 0.0 }
 0x13d   : > { %v120_v60 = vcombine.high %v113_v59, %v113_v59 }
 0x13f   : > { %219 = vmatprep.subr.msk.mxu0 %vm28_vm0, %v120_v60 }
 0x140   : > { %220 = vmatpush1.msk.msra.mxu0 %vm28_vm0, %v113_v59 }
 0x141   : > { %221 = vmatmul.mubr.msk.f32.vlgmr.msra.gmra.mxu0 %vm121_vm1, %v300_v20 }
 0x201   : > { %v195_v62 = vpop.f32.mrf.mxu0 }
 0x202   : > { %v196_v63 = vadd.f32 %v195_v62, %v117_v61  ;;  %81 = sbr.rel (!%p79_p0) target bundleno = 181 (0xb5), region = 49 }
 0x203   : > { %v197_v0 = vpop.f32.mrf.mxu0 }
 0x204   : > { %202 = vst [vmem:[%s201_s9] sm:$0xff] %v196_v63  ;;  %v198_v1 = vadd.f32 %v197_v0, %v117_v61 }
 0x206   : > { %203 = vst [vmem:[%s201_s9 + $0x8] sm:$0xff] %v198_v1 }

</bundles_post_ra>
